<compile_context>
chip_gen: v5e
topology: v5e:2x2
jax: 0.10.0
libtpu: 0.0.40
codegen_flags: <defaults>
</compile_context>

<pallas_src>
import functools

import jax
import jax.numpy as jnp
from jax.experimental import pallas as pl
from jax.experimental.pallas import tpu as pltpu


def _rmsnorm_kernel(x_ref, w_ref, o_ref, *, eps):
    # x_ref: (block_rows, dim) ; w_ref: (1, dim) ; o_ref: (block_rows, dim)
    x = x_ref[...].astype(jnp.float32)
    w = w_ref[...].astype(jnp.float32)
    # mean of squares over the last (lane) axis -> RMS
    ms = jnp.mean(x * x, axis=-1, keepdims=True)      # (block_rows, 1)
    rms = jnp.sqrt(ms)                                # == ||x||_2 / sqrt(dim)
    # One per-row reciprocal + broadcast vmul instead of a full-tile divide.
    # approx=False keeps numerical parity with the divide-based torch reference.
    inv = pl.reciprocal(rms + eps, approx=False)      # eps outside sqrt, as in torch
    o_ref[...] = (w * (x * inv)).astype(o_ref.dtype)


def _sublane_multiple(dtype):
    # f32 -> 8, bf16/f16 -> 16, int8/fp8 -> 32 (native vreg sublane packing)
    return max(8, 32 // jnp.dtype(dtype).itemsize)


_TILE_VMEM_BUDGET = 24 * 1024 * 1024   # bytes for pipelined tiles + f32 temps
_VMEM_LIMIT_BYTES = 48 * 1024 * 1024   # scoped-VMEM limit (safe on v5e/v6e/v7x)


def _pick_block_rows(rows, dim, dtype):
    """Largest sublane-aligned row tile that fits the VMEM budget, while keeping
    enough grid steps for pipelining / v7x megacore sharding."""
    sub = _sublane_multiple(dtype)
    itemsize = jnp.dtype(dtype).itemsize
    # per-row footprint: 2x double-buffered input + 2x output block + ~2 f32 temps
    bytes_per_row = dim * (2 * itemsize + 2 * itemsize + 2 * 4)
    max_rows = max(sub, (_TILE_VMEM_BUDGET // max(bytes_per_row, 1)) // sub * sub)
    rows_rounded = ((rows + sub - 1) // sub) * sub
    block_rows = min(max_rows, rows_rounded)
    # keep >= ~8 grid iterations when there is enough work
    if rows_rounded // block_rows < 8:
        target = ((rows_rounded // 8 + sub - 1) // sub) * sub
        block_rows = min(block_rows, max(target, sub))
    return max(block_rows, sub)


def rmsnorm(x, weight, eps=1e-5, block_rows=None):
    """RMSNorm over the last axis of x. weight has shape (x.shape[-1],)."""
    orig_shape = x.shape
    dim = orig_shape[-1]
    rows = 1
    for s in orig_shape[:-1]:
        rows *= s
    x2d = x.reshape(rows, dim)
    w2d = weight.reshape(1, dim)

    if block_rows is None:
        block_rows = _pick_block_rows(rows, dim, x.dtype)

    grid = (pl.cdiv(rows, block_rows),)   # ragged edge block is masked by Pallas

    x_item = jnp.dtype(x.dtype).itemsize
    w_item = jnp.dtype(weight.dtype).itemsize
    cost = pl.CostEstimate(
        flops=3 * rows * dim,
        transcendentals=2 * rows,                              # sqrt + recip per row
        bytes_accessed=2 * rows * dim * x_item + dim * w_item,
    )

    out = pl.pallas_call(
        functools.partial(_rmsnorm_kernel, eps=eps),
        out_shape=jax.ShapeDtypeStruct((rows, dim), x.dtype),
        grid_spec=pltpu.PrefetchScalarGridSpec(
            num_scalar_prefetch=0,
            grid=grid,
            in_specs=[
                pl.BlockSpec((block_rows, dim), lambda i: (i, 0)),
                pl.BlockSpec((1, dim), lambda i: (0, 0)),
            ],
            out_specs=pl.BlockSpec((block_rows, dim), lambda i: (i, 0)),
        ),
        compiler_params=pltpu.CompilerParams(
            dimension_semantics=("parallel",),
            vmem_limit_bytes=_VMEM_LIMIT_BYTES,
        ),
        cost_estimate=cost,
    )(x2d, w2d)

    return out.reshape(orig_shape)


def _rmsnorm_ref(x, weight, eps=1e-5):
    # pure-JAX reference mirroring the PyTorch forward exactly
    xf = x.astype(jnp.float32)
    norm = jnp.linalg.norm(xf, ord=2, axis=-1, keepdims=True) * (x.shape[-1] ** -0.5)
    return (weight.astype(jnp.float32) * (xf / (norm + eps))).astype(x.dtype)


if __name__ == "__main__":
    key = jax.random.PRNGKey(0)
    batch, seq, hidden = 2, 8, 32

    x = jax.random.normal(key, (batch, seq, hidden), dtype=jnp.float32)
    # deterministic parameter init: nn.Parameter(torch.ones(dim))
    weight = jnp.ones((hidden,), dtype=jnp.float32)

    out = rmsnorm(x, weight, eps=1e-5)
    out = jax.block_until_ready(out)

    ref = _rmsnorm_ref(x, weight, eps=1e-5)
    assert out.shape == x.shape
    assert jnp.allclose(out, ref, atol=1e-5, rtol=1e-5), "mismatch vs reference"

    print("KERNEL_OK")
</pallas_src>

<mosaic_0001>
module attributes {stable_mosaic.version = 11 : i64} {
  func.func @_rmsnorm_kernel(%arg0: i32, %arg1: memref<8x32xf32, #tpu.memory_space<vmem>>, %arg2: memref<1x32xf32, #tpu.memory_space<vmem>>, %arg3: memref<8x32xf32, #tpu.memory_space<vmem>>) attributes {dimension_semantics = [#tpu.dimension_semantics<parallel>], iteration_bounds = array<i64: 2>, scalar_prefetch = 0 : i64, scratch_operands = 0 : i64, tpu.core_type = #tpu.core_type<tc>, window_params = [{transform_indices = @transform_0, window_bounds = array<i64: 8, 32>}, {pipeline_mode = #tpu.pipeline_mode<synchronous>, transform_indices = @transform_1, window_bounds = array<i64: 1, 32>}, {transform_indices = @transform_2, window_bounds = array<i64: 8, 32>}]} {
    %c0 = arith.constant 0 : index
    %c0_0 = arith.constant 0 : index
    %0 = vector.load %arg1[%c0, %c0_0] : memref<8x32xf32, #tpu.memory_space<vmem>>, vector<8x32xf32>
    %c0_1 = arith.constant 0 : index
    %c0_2 = arith.constant 0 : index
    %1 = vector.load %arg2[%c0_1, %c0_2] : memref<1x32xf32, #tpu.memory_space<vmem>>, vector<1x32xf32>
    %2 = arith.mulf %0, %0 : vector<8x32xf32>
    %cst = arith.constant dense<0.000000e+00> : vector<8xf32>
    %3 = vector.multi_reduction <add>, %2, %cst [1] : vector<8x32xf32> to vector<8xf32>
    %4 = vector.shape_cast %3 : vector<8xf32> to vector<8x1xf32>
    %cst_3 = arith.constant 3.200000e+01 : f32
    %5 = vector.broadcast %cst_3 : f32 to vector<8x1xf32>
    %6 = arith.divf %4, %5 : vector<8x1xf32>
    %7 = math.sqrt %6 : vector<8x1xf32>
    %cst_4 = arith.constant 9.99999974E-6 : f32
    %8 = vector.broadcast %cst_4 : f32 to vector<8x1xf32>
    %9 = arith.addf %7, %8 : vector<8x1xf32>
    %10 = tpu.reciprocal %9 : vector<8x1xf32> -> vector<8x1xf32>
    %11 = vector.broadcast %10 : vector<8x1xf32> to vector<8x32xf32>
    %12 = arith.mulf %0, %11 : vector<8x32xf32>
    %13 = vector.broadcast %1 : vector<1x32xf32> to vector<8x32xf32>
    %14 = arith.mulf %13, %12 : vector<8x32xf32>
    %c0_5 = arith.constant 0 : index
    %c0_6 = arith.constant 0 : index
    %15 = vector.load %arg3[%c0_5, %c0_6] : memref<8x32xf32, #tpu.memory_space<vmem>>, vector<8x32xf32>
    tpu.vector_store %arg3[%c0_5, %c0_6], %14 {strides = array<i32>} : memref<8x32xf32, #tpu.memory_space<vmem>>, vector<8x32xf32>,
    return
  }
  func.func @transform_0(%arg0: i32) -> (i32, i32) {
    %c0_i32 = arith.constant 0 : i32
    %c0_i32_0 = arith.constant 0 : i32
    return %arg0, %c0_i32 : i32, i32
  }
  func.func @transform_1(%arg0: i32) -> (i32, i32) {
    %c0_i32 = arith.constant 0 : i32
    %c0_i32_0 = arith.constant 0 : i32
    %c0_i32_1 = arith.constant 0 : i32
    return %c0_i32, %c0_i32_0 : i32, i32
  }
  func.func @transform_2(%arg0: i32) -> (i32, i32) {
    %c0_i32 = arith.constant 0 : i32
    %c0_i32_0 = arith.constant 0 : i32
    return %arg0, %c0_i32 : i32, i32
  }
}

</mosaic_0001>

<bundles_post_ra>
// kernel: tpu_custom_call.1
= control target key start
LH: loop header
LB: loop body
LE: loop exit
PB: predicated region body
PF: predicated region fallthrough
CT: control target
= control target key end

     0   :  { %7 = vsyncpa [#allocation3], 0  ;;  %s692_s0 = inlined_call_operand.hbm [shape: f32[16,32], index: 0, kind: input, shape index: {}]   ;;  %s693_s1 = inlined_call_operand.hbm [shape: f32[1,32], index: 1, kind: input, shape index: {}]   ;;  %s694_s2 = inlined_call_operand.hbm [shape: f32[16,32], index: 2, kind: output, shape index: {}]  }
   0x1   :  { %9 = vsyncpa [#allocation3 + $0x1], 0 }
   0x2   :  { %10 = vsyncpa [#allocation6], 0 }
   0x3   :  { %11 = vsyncpa [#allocation4], 0 }
   0x4   :  { %13 = vsyncpa [#allocation4 + $0x1], 0  ;;  %s548_s9 = smov 0   ;;  %s550_s10 = smov 0  }
   0x5   :  { %s552_s11 = smov 0   ;;  %s554_s12 = smov 0  }
   0x6 LB: > { %s569_s13 = sadd.s32 4294967295, %s529_s12   ;;  %s320_s14 = sadd.s32 4294967294, %s529_s12   ;;  %s529_s12 = sphi %s554_s12, %s704_s12   ;;  %s525_s11 = sphi %s552_s11, %s703_s11   ;;  %s521_s10 = sphi %s550_s10, %s702_s10   ;;  %s517_s9 = sphi %s548_s9, %s701_s9  }
   0x7   : > { %p39_p0 = scmp.ne.s32.totalorder %s521_s10, %s517_s9  ;;  %p40_p1 = scmp.eq.s32.totalorder %s569_s13, 0 }
   0x8   : > { %p84_p2 = scmp.eq.s32.totalorder %s569_s13, 1  ;;  %p90_p3 = scmp.eq.s32.totalorder %s320_s14, 1 }
   0x9   : > { %p578_p4 = por %p40_p1, %p39_p0  ;;  %p321_p5 = scmp.ge.s32.totalorder %s529_s12, 1 }
   0xa   : > { %p583_p6 = por %p90_p3, %p39_p0  ;;  %p97_p7 = scmp.lt.s32.totalorder %s529_s12, 3 }
   0xb   : > { %s109_s19 = sshll.u32 %s693_s1, 4  ;;  %s531_s21 = smov [#allocation5]   ;;  %s110_s19 = int_to_ptr.hbm [resolvable:$true] %s109_s19 }
   0xc   : > { %p591_p8 = pnand %p321_p5, %p97_p7  ;;  %s111_s22 = sshll.u32 %s531_s21, 4  ;;  %s112_s22 = int_to_ptr.vmem [resolvable:$true] %s111_s22 }
   0xd   : > { %s601_s23 = sadd.s32 1, %s529_s12   ;;  %s26_s24 = sadd.s32 1, %s525_s11 }
   0xe   : > { %p342_p10 = pneg %p591_p8  ;;  %s23_s25 = ssub.s32 %s529_s12, %s601_s23 }
   0xf   : > { %p24_p12 = scmp.eq.s32.totalorder %s23_s25, 0  ;;  %p33_p13 = scmp.ne.s32.totalorder %s525_s11, %s521_s10 }
  0x10   : > { %p343_p11 = pnand %p342_p10, %p40_p1  ;;  %p34_p0 = scmp.eq.s32.totalorder %s529_s12, 0 }
  0x11   : > { %s610_s26 = scalar_select %p24_p12, %s525_s11, %s26_s24  }
  0x12   : > { %345 = dma.hbm_to_vmem [thread:$0]  (!%p343_p11), %s110_s19, 16, %s112_s22, [#allocation6]  }
  0x13   : > { %p614_p3 = por %p84_p2, %p33_p13  ;;  %p355_p5 = scmp.lt.s32.totalorder %s529_s12, 2 }
  0x14   : > { %s122_s28 = sand.u32 1, %s525_s11   ;;  %s325_s29 = sshll.u32 %s529_s12, 3 }
  0x15   : > { %p35_p7 = por %p34_p0, %p33_p13  ;;  %s324_s30 = sshll.u32 %s122_s28, 3 }
  0x16   : > { %s130_s5 = scalar_lea.hbm %s692_s0, %s325_s29  ;;  %s126_s7 = scalar_lea.vmem [#allocation2], %s324_s30 }
  0x17   : > { %s132_s6 = sshll.u32 %s130_s5, 4  ;;  %s134_s8 = sshll.u32 %s126_s7, 4  ;;  %s133_s6 = int_to_ptr.hbm [resolvable:$true] %s132_s6  ;;  %s135_s8 = int_to_ptr.vmem [resolvable:$true] %s134_s8 }
  0x18   : > { %p624_p10 = pnand %p355_p5, %p35_p7  ;;  %s123_s17 = scalar_lea.sflag [#allocation3], %s122_s28 }
  0x19   : > { %s429_s18 = sshra.s32 %s133_s6, 4  ;;  %s436_s24 = scalar_lea.hbm %s692_s0, 16  ;;  %s430_s18 = int_to_ptr.hbm [resolvable:$true] %s429_s18 }
  0x1a   : > { %s431_s19 = scalar_lea.hbm %s430_s18, 8  ;;  %p433_p11 = pneg %p624_p10 }
  0x1b   : > { %p432_p2 = scmp.ne.s32.totalorder %s430_s18, %s431_s19  ;;  %p437_p0 = scmp.lt.s32.totalorder %s430_s18, %s692_s0 }
  0x1c   : > { %p438_p5 = scmp.lt.s32.totalorder %s436_s24, %s431_s19 }
  0x1d   : > { %p434_p12 = pnand %p433_p11, %p432_p2 }
  0x1e   : > { %p439_p7 = por %p438_p5, %p437_p0 }
  0x1f   : > { %p435_p13 = pneg %p434_p12 }
  0x21   : > { %p440_p9 = pnand %p439_p7, %p435_p13 }
  0x23   : > { %443 = shalt.err (!%p440_p9)
}
  0x24   : > { %349 = dma.hbm_to_vmem [thread:$0]  (!%p624_p10), %s133_s6, 128, %s135_s8, %s123_s17  }
  0x25   : > { %143 = sbr.rel (%p591_p8) target bundleno = 214 (0xd6), region = 28  ;;  %s641_s28 = sand.u32 (!%p591_p8), 1, %s521_s10  }
  0x26   : > { %s327_s30 = sshll.u32 (!%p591_p8), %s641_s28, 3  ;;  %s146_s3 = scalar_lea.sflag (!%p591_p8), [#allocation3], %s641_s28 }
  0x27   : > { %s149_s4 = scalar_lea.vmem (!%p591_p8), [#allocation2], %s327_s30 }
  0x2a   : > { %504 = dma.done.wait (%p578_p4), %s146_s3, 128  }
  0x2b   : > { %506 = vsyncadd (%p578_p4), %s146_s3, 4294967168 }
  0x2c   : > { %508 = dma.done.wait (%p40_p1), [#allocation6], 16  }
  0x2d   : > { %510 = vsyncadd (%p40_p1), [#allocation6], 4294967280  ;;  %v176_v0 = vld [vmem:[%s149_s4] sm:$0xff]  ;;  %vm179_vm0 = vcmask 261120   ;;  %v532_v3 = vmov 32.0   ;;  %s331_s15 = sshll.u32 %s569_s13, 3 }
  0x2e   : > { %v178_v1 = vmul.f32 %v176_v0, %v176_v0  ;;  %393 = vrcp.f32 %v532_v3  ;;  %s235_s6 = scalar_lea.hbm %s694_s2, %s331_s15  ;;  %v392_v32 = vld [vmem:[#allocation5] ss:$0 sm:$0xff]  ;;  %s175_s7 = scalar_lea.vmem [#allocation7], %s327_s30 }
  0x2f   : > { %s237_s13 = sshll.u32 %s175_s7, 4  ;;  %s239_s8 = sshll.u32 %s235_s6, 4  ;;  %s238_s13 = int_to_ptr.vmem [resolvable:$true] %s237_s13  ;;  %s240_s8 = int_to_ptr.hbm [resolvable:$true] %s239_s8 }
  0x30   : > { %v180_v2 = vsel %vm179_vm0, %v178_v1, 0.0  ;;  %s225_s14 = scalar_lea.sflag [#allocation4], %s641_s28  ;;  %s473_s17 = sshra.s32 %s240_s8, 4  ;;  %s474_s17 = int_to_ptr.hbm [resolvable:$true] %s473_s17 }
  0x31   : > { %181 = vadd.xlane.f32.xlu0 %v180_v2  ;;  %s475_s18 = scalar_lea.hbm %s474_s17, 8  ;;  %s479_s22 = scalar_lea.hbm %s694_s2, 16 }
  0x32   : > { %p476_p1 = scmp.ne.s32.totalorder %s474_s17, %s475_s18  ;;  %p480_p9 = scmp.lt.s32.totalorder %s474_s17, %s694_s2 }
  0x33   : > { %p481_p10 = scmp.lt.s32.totalorder %s479_s22, %s475_s18 }
  0x34   : > { %v394_v4 = vpop.eup %393  ;;  %p477_p4 = pnand %p476_p1, %p614_p3 }
  0x35   : > { %v184_v5 = vmul.f32 32.0, %v394_v4  ;;  %vm188_vm1 = vweird.f32 %v394_v4  ;;  %p482_p2 = por %p481_p10, %p480_p9 }
  0x36   : > { %p478_p8 = pneg %p477_p4 }
  0x37   : > { %v185_v6 = vsub.f32 1.0, %v184_v5 }
  0x38   : > { %p483_p11 = pnand %p482_p2, %p478_p8 }
  0x39   : > { %v186_v7 = vmul.f32 %v394_v4, %v185_v6 }
  0x3b   : > { %v187_v8 = vadd.f32 %v394_v4, %v186_v7 }
  0x3d   : > { %v189_v9 = vsel %vm188_vm1, %v394_v4, %v187_v8 }
  0xa4   : > { %v182_v10 = vpop.xlane.xlu0 %181 }
  0xa5   : > { %v190_v11 = vmul.f32 %v189_v9, %v182_v10 }
  0xa7   : > { %395 = vrsqrt.f32 %v190_v11  ;;  %vm198_vm2 = vcmp.eq.f32.partialorder %v190_v11, inf  ;;  %v201_v19 = vand.u32 2147483648, %v190_v11  ;;  %vm200_vm3 = vcmp.eq.f32.partialorder %v190_v11, 0.0 }
  0xad   : > { %v396_v12 = vpop.eup %395 }
  0xae   : > { %v192_v13 = vmul.f32 %v396_v12, %v190_v11 }
  0xb0   : > { %v193_v14 = vmul.f32 %v396_v12, %v192_v13 }
  0xb2   : > { %v194_v15 = vmul.f32 0.5, %v193_v14 }
  0xb4   : > { %v195_v16 = vsub.f32 1.5, %v194_v15 }
  0xb6   : > { %v196_v17 = vmul.f32 %v396_v12, %v195_v16 }
  0xb8   : > { %v197_v18 = vmul.f32 %v196_v17, %v190_v11 }
  0xba   : > { %v199_v20 = vsel %vm198_vm2, %v190_v11, %v197_v18 }
  0xbb   : > { %v202_v21 = vsel %vm200_vm3, %v201_v19, %v199_v20 }
  0xbc   : > { %v203_v22 = vadd.f32 1e-05, %v202_v21 }
  0xbe   : > { %397 = vrcp.f32 %v203_v22  ;;  %v215_v26 = vand.u32 2147483648, %v203_v22  ;;  %v213_v28 = vand.u32 2147483647, %v203_v22  ;;  %vm209_vm5 = vweird.f32 %v203_v22 }
  0xc0   : > { %v216_v30 = vor.u32 1.1754944e-38, %v215_v26  ;;  %vm214_vm7 = vcmp.eq.f32.partialorder %v213_v28, 8.507059e+37 }
  0xc4   : > { %v398_v23 = vpop.eup %397 }
  0xc5   : > { %v205_v24 = vmul.f32 %v398_v23, %v203_v22  ;;  %vm210_vm4 = vweird.f32 %v398_v23 }
  0xc6   : > { %vm211_vm6 = vmor %vm209_vm5, %vm210_vm4 }
  0xc7   : > { %v206_v25 = vsub.f32 1.0, %v205_v24 }
  0xc9   : > { %v207_v27 = vmul.f32 %v398_v23, %v206_v25 }
  0xcb   : > { %v208_v29 = vadd.f32 %v398_v23, %v207_v27 }
  0xcd   : > { %v212_v31 = vsel %vm211_vm6, %v398_v23, %v208_v29 }
  0xce   : > { %v217_v33 = vsel %vm214_vm7, %v216_v30, %v212_v31 }
  0xcf   : > { %v218_v34 = vmul.f32 %v217_v33, %v176_v0 }
  0xd1   : > { %v222_v35 = vmul.f32 %v392_v32, %v218_v34 }
  0xd3   : > { %223 = vst.msk [vmem:[%s175_s7] sm:$0xff] %vm179_vm0, %v222_v35 }
  0xd4   : > { %486 = shalt.err (!%p483_p11)
}
  0xd5   : > { %340 = dma.vmem_to_hbm [thread:$0]  (%p614_p3), %s238_s13, 128, %s240_s8, %s225_s14  }
  0xd6 PF: > { %s251_s29 = sand.u32 1, %s517_s9   ;;  %p700_p12 = scmp.ge.s32.totalorder %s529_s12, 2 }
  0xd7   : > { %s252_s28 = scalar_lea.sflag [#allocation4], %s251_s29 }
  0xd8   : > { %p351_p13 = pnand %p700_p12, %p583_p6 }
  0xda   : > { %p352_p0 = pneg %p351_p13 }
  0xdc   : > { %512 = dma.done.wait (%p352_p0), %s252_s28, 128  }
  0xdd   : > { %514 = vsyncadd (%p352_p0), %s252_s28, 4294967168  ;;  %p16_p5 = scmp.ge.s32.totalorder %s601_s23, 4   ;;  %s701_s9 = smov %s521_s10 }
  0xde   : > { %s702_s10 = smov %s525_s11  ;;  %s703_s11 = smov %s610_s26 }
  0xdf   : > { %s704_s12 = smov %s601_s23  ;;  %18 = sbr.rel (!%p16_p5) target bundleno = 6 (0x6), region = 77 }
  0xe4   :  { %258 = vsyncpa [#allocation3], 1 }
  0xe5   :  { %260 = vsyncpa [#allocation3 + $0x1], 1 }
  0xe6   :  { %261 = vsyncpa [#allocation6], 1 }
  0xe7   :  { %262 = vsyncpa [#allocation4], 1 }
  0xe8   :  { %264 = vsyncpa [#allocation4 + $0x1], 1 }

</bundles_post_ra>
